<compile_context>
chip_gen: v6e
topology: v6e:2x2x1
jax: 0.10.0
libtpu: 0.0.40
codegen_flags: <defaults>
</compile_context>

<pallas_src>
import functools
import math

import jax
import jax.numpy as jnp
from jax.experimental import pallas as pl
from jax.experimental.pallas import tpu as pltpu

_LANE = 128
_DEFAULT_BLOCK_BUDGET_BYTES = 8 * 1024 * 1024    # ~2048 rows of 128-lane f32
_SWEET_SPOT_BLOCK_BYTES = 256 * 1024             # >=85% of measured HBM roofline
_VMEM_LIMIT_BYTES = 32 * 1024 * 1024             # safe on v5e/v6e/v7x


def _round_up(x, m):
    return ((x + m - 1) // m) * m


@functools.lru_cache(maxsize=1)
def _cores_per_device():
    """Best-effort TensorCores-per-device query (v7x=2); safe fallback = 1."""
    try:
        info = pltpu.get_tpu_info()
        for name in ("num_cores", "num_tensorcores", "tensorcore_count",
                     "num_cores_per_chip"):
            v = getattr(info, name, None)
            if isinstance(v, int) and v > 0:
                return v
    except Exception:
        pass
    try:
        dev = jax.devices()[0]
        for name in ("num_cores", "core_count"):
            v = getattr(dev, name, None)
            if isinstance(v, int) and v > 0:
                return v
    except Exception:
        pass
    return 1


def _offset_scale_kernel(x_ref, gb_ref, q_ref, qp_ref, k_ref):
    # x_ref: (tile, Dp) row block.  gb_ref: (6, Dp) = [gamma(3); beta(3)],
    # resident in VMEM (constant index_map).  Compute in f32 (VPU has huge
    # slack in a memory-bound kernel), cast only the stored result.
    x = x_ref[...].astype(jnp.float32)
    gb = gb_ref[...].astype(jnp.float32)
    q_ref[...] = (x * gb[0:1, :] + gb[3:4, :]).astype(q_ref.dtype)
    qp_ref[...] = (x * gb[1:2, :] + gb[4:5, :]).astype(qp_ref.dtype)
    k_ref[...] = (x * gb[2:3, :] + gb[5:6, :]).astype(k_ref.dtype)


def _choose_tile(Rp, Dp, in_item, out_item, sub_mult, budget):
    # Pipeline working set per row: (1 input + 3 outputs) x 2 buffers.
    per_row = 2 * (in_item + 3 * out_item) * Dp
    cap = max(sub_mult, (budget // per_row) // sub_mult * sub_mult)
    # Rows giving ~256 KiB blocks per stream (streaming sweet spot).
    good = _round_up(pl.cdiv(_SWEET_SPOT_BLOCK_BYTES, Dp * max(in_item, out_item)),
                     sub_mult)
    good = max(sub_mult, min(good, cap))

    if Rp <= sub_mult:
        return Rp                                  # block == full row extent
    cores = _cores_per_device()
    if Rp <= cap:
        if cores > 1 and Rp >= cores * good:
            # Split near-evenly across TensorCores, blocks stay in sweet spot.
            return min(cap, max(good, _round_up(pl.cdiv(Rp, cores), sub_mult)))
        return Rp                                  # 1-TC chips: single step
    tile = cap
    if cores > 1:
        # Aim for >= 4*cores near-equal steps so megacore stays balanced.
        tile = min(tile, max(good, _round_up(pl.cdiv(Rp, 4 * cores), sub_mult)))
    return tile


@functools.partial(jax.jit, static_argnames=("row_tile", "block_budget_bytes"))
def offset_scale(x, gamma, beta, *, row_tile=None,
                 block_budget_bytes=_DEFAULT_BLOCK_BUDGET_BYTES):
    N, S, D = x.shape
    assert gamma.shape == (3, D) and beta.shape == (3, D)

    out_dtype = jnp.promote_types(x.dtype,
                                  jnp.promote_types(gamma.dtype, beta.dtype))
    in_item = jnp.dtype(x.dtype).itemsize
    out_item = jnp.dtype(out_dtype).itemsize
    sub_mult = max(8, 32 // min(in_item, out_item))   # 8 f32 / 16 bf16 rows

    # ---- collapse (N, S) into one row axis --------------------------------
    R = N * S

    # ---- generalized lane packing: last dim -> multiple of 128 lanes -------
    pack = 1
    if D % _LANE != 0:
        k = math.lcm(D, _LANE) // D
        if k <= 64 and R % k == 0:
            pack = k
    Rp, Dp = R // pack, D * pack
    x2 = x.reshape(Rp, Dp)                         # row-major: free reshape

    gb = jnp.concatenate([gamma, beta], axis=0)    # (6, D) single param stream
    if pack > 1:
        gb = jnp.tile(gb, (1, pack))               # (6, Dp), period-D lanes

    # ---- row tile (no padding: ragged last block handled by Pallas) --------
    if row_tile is not None:
        tile = int(row_tile)
        assert tile == Rp or (0 < tile <= Rp and tile % sub_mult == 0), (
            f"row_tile must be a multiple of {sub_mult} (or the full row count)")
    else:
        tile = _choose_tile(Rp, Dp, in_item, out_item, sub_mult,
                            block_budget_bytes)

    grid = (pl.cdiv(Rp, tile),)
    row_spec = pl.BlockSpec((tile, Dp), lambda i: (i, 0))
    param_spec = pl.BlockSpec((6, Dp), lambda i: (0, 0))
    out_struct = jax.ShapeDtypeStruct((Rp, Dp), out_dtype)

    q2, qp2, k2 = pl.pallas_call(
        _offset_scale_kernel,
        out_shape=(out_struct, out_struct, out_struct),
        grid_spec=pltpu.PrefetchScalarGridSpec(
            num_scalar_prefetch=0,
            grid=grid,
            in_specs=[row_spec, param_spec],
            out_specs=[row_spec, row_spec, row_spec],
        ),
        compiler_params=pltpu.CompilerParams(
            dimension_semantics=("parallel",),
            vmem_limit_bytes=_VMEM_LIMIT_BYTES,
        ),
    )(x2, gb)

    def _unpack(o):
        return o.reshape(N, S, D)

    return _unpack(q2), _unpack(qp2), _unpack(k2)


def offset_scale_ref(x, gamma, beta):
    # Pure-JAX reference mirroring the PyTorch forward (incl. type promotion).
    out = x[:, :, None, :] * gamma[None, None] + beta[None, None]
    return out[..., 0, :], out[..., 1, :], out[..., 2, :]


def _check(x, gamma, beta, atol, **kw):
    q, qp, k = offset_scale(x, gamma, beta, **kw)
    jax.block_until_ready((q, qp, k))
    q_r, qp_r, k_r = offset_scale_ref(x, gamma, beta)
    assert q.shape == x.shape and qp.shape == x.shape and k.shape == x.shape
    assert jnp.allclose(q.astype(jnp.float32), q_r.astype(jnp.float32), atol=atol)
    assert jnp.allclose(qp.astype(jnp.float32), qp_r.astype(jnp.float32), atol=atol)
    assert jnp.allclose(k.astype(jnp.float32), k_r.astype(jnp.float32), atol=atol)


if __name__ == "__main__":
    key = jax.random.PRNGKey(0)
    kx, kg, kx2, kg2, kx3, kg3, kx4 = jax.random.split(key, 7)

    # Case 1: module-sized shapes (N, S, D) = (2, 8, 32).
    # D=32 -> packed to 128 lanes (k=4), single-step grid, no padding anywhere.
    N, S, D = 2, 8, 32
    x = jax.random.normal(kx, (N, S, D), dtype=jnp.float32)
    gamma = 0.02 * jax.random.normal(kg, (3, D), dtype=jnp.float32)  # std=0.02 init
    beta = jnp.zeros((3, D), dtype=jnp.float32)
    _check(x, gamma, beta, atol=1e-6)

    # Case 2: generalized packing path (D=96 -> 384 lanes, k=4).
    N2, S2, D2 = 2, 8, 96
    x2 = jax.random.normal(kx2, (N2, S2, D2), dtype=jnp.float32)
    gamma2 = 0.02 * jax.random.normal(kg2, (3, D2), dtype=jnp.float32)
    beta2 = jnp.zeros((3, D2), dtype=jnp.float32)
    _check(x2, gamma2, beta2, atol=1e-6)

    # Case 3: D already lane-aligned (D=128), f32.
    N3, S3, D3 = 2, 40, 128
    x3 = jax.random.normal(kx3, (N3, S3, D3), dtype=jnp.float32)
    gamma3 = 0.02 * jax.random.normal(kg3, (3, D3), dtype=jnp.float32)
    beta3 = jnp.zeros((3, D3), dtype=jnp.float32)
    _check(x3, gamma3, beta3, atol=1e-6)

    # Case 4: ragged last block (100 rows, tile=32 -> 4 grid steps, last=4 rows).
    N4, S4, D4 = 2, 50, 128
    x4 = jax.random.normal(kx4, (N4, S4, D4), dtype=jnp.float32)
    _check(x4, gamma3, beta3, atol=1e-6, row_tile=32)

    # Case 5: bf16 activations + bf16 params (16-row sublane alignment).
    xb = x3.astype(jnp.bfloat16)
    gb_ = gamma3.astype(jnp.bfloat16)
    bb = beta3.astype(jnp.bfloat16)
    _check(xb, gb_, bb, atol=1e-2)

    print("KERNEL_OK")
</pallas_src>

<mosaic_0001>
module attributes {stable_mosaic.version = 11 : i64} {
  func.func @_offset_scale_kernel(%arg0: i32, %arg1: memref<4x128xf32, #tpu.memory_space<vmem>>, %arg2: memref<6x128xf32, #tpu.memory_space<vmem>>, %arg3: memref<4x128xf32, #tpu.memory_space<vmem>>, %arg4: memref<4x128xf32, #tpu.memory_space<vmem>>, %arg5: memref<4x128xf32, #tpu.memory_space<vmem>>) attributes {dimension_semantics = [#tpu.dimension_semantics<parallel>], iteration_bounds = array<i64: 1>, scalar_prefetch = 0 : i64, scratch_operands = 0 : i64, tpu.core_type = #tpu.core_type<tc>, window_params = [{transform_indices = @transform_0, window_bounds = array<i64: 4, 128>}, {pipeline_mode = #tpu.pipeline_mode<synchronous>, transform_indices = @transform_1, window_bounds = array<i64: 6, 128>}, {transform_indices = @transform_2, window_bounds = array<i64: 4, 128>}, {transform_indices = @transform_3, window_bounds = array<i64: 4, 128>}, {transform_indices = @transform_4, window_bounds = array<i64: 4, 128>}]} {
    %c0 = arith.constant 0 : index
    %c0_0 = arith.constant 0 : index
    %0 = vector.load %arg1[%c0, %c0_0] : memref<4x128xf32, #tpu.memory_space<vmem>>, vector<4x128xf32>
    %c0_1 = arith.constant 0 : index
    %c0_2 = arith.constant 0 : index
    %1 = vector.load %arg2[%c0_1, %c0_2] : memref<6x128xf32, #tpu.memory_space<vmem>>, vector<6x128xf32>
    %2 = vector.extract_strided_slice %1 {offsets = [0, 0], sizes = [1, 128], strides = [1, 1]} : vector<6x128xf32> to vector<1x128xf32>
    %3 = vector.broadcast %2 : vector<1x128xf32> to vector<4x128xf32>
    %4 = arith.mulf %0, %3 : vector<4x128xf32>
    %5 = vector.extract_strided_slice %1 {offsets = [3, 0], sizes = [1, 128], strides = [1, 1]} : vector<6x128xf32> to vector<1x128xf32>
    %6 = vector.broadcast %5 : vector<1x128xf32> to vector<4x128xf32>
    %7 = arith.addf %4, %6 : vector<4x128xf32>
    %c0_3 = arith.constant 0 : index
    %c0_4 = arith.constant 0 : index
    %8 = vector.load %arg3[%c0_3, %c0_4] : memref<4x128xf32, #tpu.memory_space<vmem>>, vector<4x128xf32>
    tpu.vector_store %arg3[%c0_3, %c0_4], %7 {strides = array<i32>} : memref<4x128xf32, #tpu.memory_space<vmem>>, vector<4x128xf32>,
    %9 = vector.extract_strided_slice %1 {offsets = [1, 0], sizes = [1, 128], strides = [1, 1]} : vector<6x128xf32> to vector<1x128xf32>
    %10 = vector.broadcast %9 : vector<1x128xf32> to vector<4x128xf32>
    %11 = arith.mulf %0, %10 : vector<4x128xf32>
    %12 = vector.extract_strided_slice %1 {offsets = [4, 0], sizes = [1, 128], strides = [1, 1]} : vector<6x128xf32> to vector<1x128xf32>
    %13 = vector.broadcast %12 : vector<1x128xf32> to vector<4x128xf32>
    %14 = arith.addf %11, %13 : vector<4x128xf32>
    %c0_5 = arith.constant 0 : index
    %c0_6 = arith.constant 0 : index
    %15 = vector.load %arg4[%c0_5, %c0_6] : memref<4x128xf32, #tpu.memory_space<vmem>>, vector<4x128xf32>
    tpu.vector_store %arg4[%c0_5, %c0_6], %14 {strides = array<i32>} : memref<4x128xf32, #tpu.memory_space<vmem>>, vector<4x128xf32>,
    %16 = vector.extract_strided_slice %1 {offsets = [2, 0], sizes = [1, 128], strides = [1, 1]} : vector<6x128xf32> to vector<1x128xf32>
    %17 = vector.broadcast %16 : vector<1x128xf32> to vector<4x128xf32>
    %18 = arith.mulf %0, %17 : vector<4x128xf32>
    %19 = vector.extract_strided_slice %1 {offsets = [5, 0], sizes = [1, 128], strides = [1, 1]} : vector<6x128xf32> to vector<1x128xf32>
    %20 = vector.broadcast %19 : vector<1x128xf32> to vector<4x128xf32>
    %21 = arith.addf %18, %20 : vector<4x128xf32>
    %c0_7 = arith.constant 0 : index
    %c0_8 = arith.constant 0 : index
    %22 = vector.load %arg5[%c0_7, %c0_8] : memref<4x128xf32, #tpu.memory_space<vmem>>, vector<4x128xf32>
    tpu.vector_store %arg5[%c0_7, %c0_8], %21 {strides = array<i32>} : memref<4x128xf32, #tpu.memory_space<vmem>>, vector<4x128xf32>,
    return
  }
  func.func @transform_0(%arg0: i32) -> (i32, i32) {
    %c0_i32 = arith.constant 0 : i32
    %c0_i32_0 = arith.constant 0 : i32
    return %arg0, %c0_i32 : i32, i32
  }
  func.func @transform_1(%arg0: i32) -> (i32, i32) {
    %c0_i32 = arith.constant 0 : i32
    %c0_i32_0 = arith.constant 0 : i32
    %c0_i32_1 = arith.constant 0 : i32
    return %c0_i32, %c0_i32_0 : i32, i32
  }
  func.func @transform_2(%arg0: i32) -> (i32, i32) {
    %c0_i32 = arith.constant 0 : i32
    %c0_i32_0 = arith.constant 0 : i32
    return %arg0, %c0_i32 : i32, i32
  }
  func.func @transform_3(%arg0: i32) -> (i32, i32) {
    %c0_i32 = arith.constant 0 : i32
    %c0_i32_0 = arith.constant 0 : i32
    return %arg0, %c0_i32 : i32, i32
  }
  func.func @transform_4(%arg0: i32) -> (i32, i32) {
    %c0_i32 = arith.constant 0 : i32
    %c0_i32_0 = arith.constant 0 : i32
    return %arg0, %c0_i32 : i32, i32
  }
}

</mosaic_0001>

<bundles_post_ra>
// kernel: tile.9
= control target key start
LH: loop header
LB: loop body
LE: loop exit
PB: predicated region body
PF: predicated region fallthrough
CT: control target
= control target key end

     0   :  { %vm34_vm0 = vcmask 1045508   ;;  %s52_s18 = smov 48  ;;  %s63_s19 = smov 48  ;;  %vm36_vm1 = vcmask 261120   ;;  %vm47_vm2 = vcmask 1048320   ;;  %vm58_vm3 = vcmask 785920   ;;  %s130_s0 = inlined_call_operand.vmem [shape: f32[6,4,32], index: 0, kind: input, shape index: {}]   ;;  %s131_s1 = inlined_call_operand.vmem [shape: f32[6,128], index: 1, kind: output, shape index: {}]  }
   0x1   :  { %v75_v0 = vld [vmem:[%s130_s0 + $0x14] sm:$0xf]  ;;  %v76_v1 = vld [vmem:[%s130_s0 + $0x10] sm:$0xf]  ;;  %v77_v2 = vld [vmem:[%s130_s0 + $0xc] sm:$0xf] }
   0x2   :  { %9 = vst [vmem:[#allocation0 + $0x28] sm:$0xf] %v75_v0  ;;  %14 = vst [vmem:[#allocation0 + $0x20] sm:$0xf] %v76_v1  ;;  %v78_v3 = vld [vmem:[%s130_s0 + $0x8] sm:$0xf] }
   0x3   :  { %19 = vst [vmem:[#allocation0 + $0x18] sm:$0xf] %v77_v2  ;;  %v79_v4 = vld [vmem:[%s130_s0 + $0x4] sm:$0xf]  ;;  %v29_v5 = vld [vmem:[%s130_s0] sm:$0xf] }
   0x4   :  { %24 = vst [vmem:[#allocation0 + $0x10] sm:$0xf] %v78_v3  ;;  %28 = vst [vmem:[#allocation0 + $0x8] sm:$0xf] %v79_v4  ;;  %s41_s0 = smov 48  ;;  %s32_s20 = smov 48 }
   0x5   :  { %30 = vst [vmem:[#allocation0] sm:$0xf] %v29_v5  ;;  %s83_s21 = smov 96   ;;  %s84_s22 = smov 32   ;;  %vm69_vm4 = vcmask 523520  }
   0x6   :  { %s85_s25 = smov 64  }
   0xc   :  { %v39_v6 = vld [vmem:[#allocation0 + $0x3] ss:$8 sm:$0xf]   ;;  %v50_v9 = vld [vmem:[#allocation0 + $0x2] ss:$8 sm:$0xf]  }
   0xd   :  { %v42_v7 = vld [vmem:[#allocation0 + $0x3] ss:$8 sm:%s41_s0]   ;;  %v53_v10 = vld [vmem:[#allocation0 + $0x2] ss:$8 sm:%s52_s18]   ;;  %v64_v12 = vld [vmem:[#allocation0 + $0x1] ss:$8 sm:%s63_s19]  }
   0xe   :  { %v44_v8 = vsel %vm34_vm0, %v42_v7, %v39_v6  ;;  %v61_v11 = vld [vmem:[#allocation0 + $0x1] ss:$8 sm:$0xf]   ;;  %v55_v13 = vsel %vm34_vm0, %v53_v10, %v50_v9  ;;  %v31_v15 = vld [vmem:[#allocation0] ss:$8 sm:$0xf]  }
   0xf   :  { %45 = vrot.lane.b32.xlu0 %v44_v8, %s83_s21  ;;  %v66_v14 = vsel %vm34_vm0, %v64_v12, %v61_v11  ;;  %v33_v16 = vld [vmem:[#allocation0] ss:$8 sm:%s32_s20]  }
  0x10   :  { %67 = vrot.lane.b32.xlu1 %v66_v14, %s84_s22  ;;  %v35_v17 = vsel %vm34_vm0, %v33_v16, %v31_v15 }
  0x11   :  { %37 = vst.msk [vmem:[%s131_s1] sm:$0x3f] %vm36_vm1, %v35_v17  }
  0x13   :  { %56 = vrot.lane.b32.xlu0 %v55_v13, %s85_s25 }
  0x81   :  { %v46_v18 = vpop.permute.xlu0 %45  }
  0x82   :  { %48 = vst.msk [vmem:[%s131_s1] sm:$0x3f] %vm47_vm2, %v46_v18   ;;  %v68_v19 = vpop.permute.xlu1 %67  }
  0x85   :  { %v57_v20 = vpop.permute.xlu0 %56  }
  0x86   :  { %59 = vst.msk [vmem:[%s131_s1] sm:$0x3f] %vm58_vm3, %v57_v20  }
  0x87   :  { %70 = vst.msk [vmem:[%s131_s1] sm:$0x3f] %vm69_vm4, %v68_v19  }

// kernel: offset_scale.1
= control target key start
LH: loop header
LB: loop body
LE: loop exit
PB: predicated region body
PF: predicated region fallthrough
CT: control target
= control target key end

     0   :  { %v16_v0 = vlaneseq  ;;  %s101_s1 = inlined_call_operand.vmem [shape: f32[6,128], index: 1, kind: input, shape index: {}]   ;;  %s102_s0 = inlined_call_operand.vmem [shape: f32[4,128], index: 0, kind: input, shape index: {}]   ;;  %s103_s2 = inlined_call_operand.vmem [shape: f32[4,128], index: 2, kind: output, shape index: {0}]   ;;  %s104_s3 = inlined_call_operand.vmem [shape: f32[4,128], index: 3, kind: output, shape index: {1}]   ;;  %s105_s4 = inlined_call_operand.vmem [shape: f32[4,128], index: 4, kind: output, shape index: {2}]  }
   0x1   :  { %v15_v2 = vld [vmem:[%s101_s1] sm:$0x3f] }
   0x2   :  { %v17_v1 = vshrl.u32 %v16_v0, 7  ;;  %v14_v7 = vld [vmem:[%s102_s0] sm:$0xf] }
   0x4   :  { %v18_v3 = vsub.s32 0, %v17_v1  ;;  %v23_v4 = vsub.s32 3, %v17_v1  ;;  %v29_v5 = vsub.s32 1, %v17_v1  ;;  %v34_v6 = vsub.s32 4, %v17_v1 }
   0x5   :  { %v40_v8 = vsub.s32 2, %v17_v1  ;;  %v45_v9 = vsub.s32 5, %v17_v1 }
   0x6   :  { %v19_v10 = vrot.slane %v15_v2, %v18_v3  ;;  %v24_v11 = vrot.slane %v15_v2, %v23_v4  ;;  %v30_v12 = vrot.slane %v15_v2, %v29_v5  ;;  %v35_v13 = vrot.slane %v15_v2, %v34_v6 }
   0x7   :  { %v41_v14 = vrot.slane %v15_v2, %v40_v8  ;;  %v46_v15 = vrot.slane %v15_v2, %v45_v9 }
   0x8   :  { %v20_v16 = vmul.f32 %v19_v10, %v14_v7  ;;  %v31_v17 = vmul.f32 %v30_v12, %v14_v7 }
   0x9   :  { %v42_v18 = vmul.f32 %v41_v14, %v14_v7 }
   0xa   :  { %v25_v19 = vadd.f32 %v24_v11, %v20_v16  ;;  %v36_v20 = vadd.f32 %v35_v13, %v31_v17 }
   0xb   :  { %v47_v21 = vadd.f32 %v46_v15, %v42_v18 }
   0xc   :  { %26 = vst [vmem:[%s103_s2] sm:$0xf] %v25_v19  ;;  %37 = vst [vmem:[%s104_s3] sm:$0xf] %v36_v20 }
   0xd   :  { %48 = vst [vmem:[%s105_s4] sm:$0xf] %v47_v21 }

</bundles_post_ra>
